<compile_context>
chip_gen: v5e
topology: v5e:2x2
jax: 0.10.0
libtpu: 0.0.40
codegen_flags: <defaults>
</compile_context>

<pallas_src>
import jax
import jax.numpy as jnp
import numpy as np
from jax.experimental import pallas as pl
from jax.experimental.pallas import tpu as pltpu

BN_EPS = 1e-5


# --------------------------------------------------------------------------
# Fused Pallas kernel: one batch element, all four linear stages chained in VMEM
# --------------------------------------------------------------------------
def _tfsenet_kernel(x_ref, w2s_t_ref, b2s_ref, w1s_ref, b1s_ref,
                    w2u_t_ref, b2u_ref, w1u_ref, b1u_ref, o_ref):
    """(C, H, W) in -> (H, W) excitation out. BatchNorm already folded into the weights."""
    z = x_ref[...]                                            # (C, H, W)
    m = jnp.mean(z, axis=0)                                   # channel avg-pool -> (H, W)

    # linear2_s (+BN+ReLU), acts along W:        (H, W) @ (W, S2) -> (H, S2)
    a2 = jnp.maximum(
        jnp.dot(m, w2s_t_ref[...], preferred_element_type=jnp.float32) + b2s_ref[...], 0.0)

    # linear1_s (+BN+ReLU), acts along H (torch permute/linear/permute-back):
    #                                            (S1, H) @ (H, S2) -> (S1, S2)
    a1 = jnp.maximum(
        jnp.dot(w1s_ref[...], a2, preferred_element_type=jnp.float32) + b1s_ref[...], 0.0)

    # linear2_u (+BN+Sigmoid), acts along S2:    (S1, S2) @ (S2, W) -> (S1, W)
    u2 = jax.nn.sigmoid(
        jnp.dot(a1, w2u_t_ref[...], preferred_element_type=jnp.float32) + b2u_ref[...])

    # linear1_u (+BN+Sigmoid), acts along S1 (permute/linear/permute-back):
    #                                            (H, S1) @ (S1, W) -> (H, W)
    e = jax.nn.sigmoid(
        jnp.dot(w1u_ref[...], u2, preferred_element_type=jnp.float32) + b1u_ref[...])

    o_ref[...] = e                                            # (H, W)


def _fold_bn(w, b, bn):
    """Fold eval-mode BatchNorm2d(1) (scalar affine) into the preceding Linear."""
    scale = bn["gamma"] / jnp.sqrt(bn["var"] + BN_EPS)
    shift = bn["beta"] - bn["mean"] * scale
    return w * scale, b * scale + shift


def tfsenet_forward(x, p):
    """TFSEnet.forward (eval mode). x: (B, C, H, W) -> (B, 1, H, W)."""
    B, C, H, W = x.shape
    S1 = p["w1s"].shape[0]
    S2 = p["w2s"].shape[0]

    w2s, b2s = _fold_bn(p["w2s"], p["b2s"], p["bn2s"])        # (S2, W), (S2,)
    w1s, b1s = _fold_bn(p["w1s"], p["b1s"], p["bn1s"])        # (S1, H), (S1,)
    w2u, b2u = _fold_bn(p["w2u"], p["b2u"], p["bn2u"])        # (W, S2), (W,)
    w1u, b1u = _fold_bn(p["w1u"], p["b1u"], p["bn1u"])        # (H, S1), (H,)

    out = pl.pallas_call(
        _tfsenet_kernel,
        out_shape=jax.ShapeDtypeStruct((B, 1, H, W), jnp.float32),
        grid=(B,),
        in_specs=[
            pl.BlockSpec((None, C, H, W), lambda b: (b, 0, 0, 0)),   # per-batch input block
            pl.BlockSpec((W, S2), lambda b: (0, 0)),                 # linear2_s weight (pre-T)
            pl.BlockSpec((1, S2), lambda b: (0, 0)),                 # linear2_s bias (row)
            pl.BlockSpec((S1, H), lambda b: (0, 0)),                 # linear1_s weight
            pl.BlockSpec((S1, 1), lambda b: (0, 0)),                 # linear1_s bias (col)
            pl.BlockSpec((S2, W), lambda b: (0, 0)),                 # linear2_u weight (pre-T)
            pl.BlockSpec((1, W), lambda b: (0, 0)),                  # linear2_u bias (row)
            pl.BlockSpec((H, S1), lambda b: (0, 0)),                 # linear1_u weight
            pl.BlockSpec((H, 1), lambda b: (0, 0)),                  # linear1_u bias (col)
        ],
        out_specs=pl.BlockSpec((None, None, H, W), lambda b: (b, 0, 0, 0)),
        compiler_params=pltpu.CompilerParams(dimension_semantics=("parallel",)),
    )(x,
      jnp.transpose(w2s), b2s.reshape(1, S2),
      w1s, b1s.reshape(S1, 1),
      jnp.transpose(w2u), b2u.reshape(1, W),
      w1u, b1u.reshape(H, 1))
    return out


# --------------------------------------------------------------------------
# Parameters (deterministic, PyTorch-default-style init; BN defaults)
# --------------------------------------------------------------------------
def init_params(key, insize, sesize):
    H, W = insize
    S1, S2 = sesize
    ks = jax.random.split(key, 8)

    def u(k, shape, fan_in):
        bound = 1.0 / np.sqrt(fan_in)
        return jax.random.uniform(k, shape, jnp.float32, -bound, bound)

    def bn():
        return {"gamma": jnp.float32(1.0), "beta": jnp.float32(0.0),
                "mean": jnp.float32(0.0), "var": jnp.float32(1.0)}

    return {
        "w1s": u(ks[0], (S1, H), H),  "b1s": u(ks[1], (S1,), H),  "bn1s": bn(),
        "w2s": u(ks[2], (S2, W), W),  "b2s": u(ks[3], (S2,), W),  "bn2s": bn(),
        "w1u": u(ks[4], (H, S1), S1), "b1u": u(ks[5], (H,), S1),  "bn1u": bn(),
        "w2u": u(ks[6], (W, S2), S2), "b2u": u(ks[7], (W,), S2),  "bn2u": bn(),
    }


# --------------------------------------------------------------------------
# Pure-JAX reference mirroring the PyTorch forward (for verification)
# --------------------------------------------------------------------------
def reference_forward(x, p):
    def bn_eval(y, bn):
        return (y - bn["mean"]) / jnp.sqrt(bn["var"] + BN_EPS) * bn["gamma"] + bn["beta"]

    m = jnp.mean(x, axis=1, keepdims=True)                    # avg_pool2d over channels
    y = m @ p["w2s"].T + p["b2s"]                             # linear2_s
    y = jnp.maximum(bn_eval(y, p["bn2s"]), 0.0)
    y = jnp.swapaxes(y, -1, -2)                               # permute(0,1,3,2)
    y = y @ p["w1s"].T + p["b1s"]                             # linear1_s
    y = jnp.maximum(bn_eval(y, p["bn1s"]), 0.0)
    y = jnp.swapaxes(y, -1, -2)                               # permute back
    y = y @ p["w2u"].T + p["b2u"]                             # linear2_u
    y = jax.nn.sigmoid(bn_eval(y, p["bn2u"]))
    y = jnp.swapaxes(y, -1, -2)                               # permute(0,1,3,2)
    y = y @ p["w1u"].T + p["b1u"]                             # linear1_u
    y = jax.nn.sigmoid(bn_eval(y, p["bn1u"]))
    return jnp.swapaxes(y, -1, -2)                            # permute back -> (B,1,H,W)


if __name__ == "__main__":
    key = jax.random.PRNGKey(0)
    kx, kp = jax.random.split(key)

    B, C = 2, 4
    insize = (16, 16)     # (H, W)
    sesize = (8, 8)       # (S1, S2)

    x = jax.random.normal(kx, (B, C, insize[0], insize[1]), jnp.float32)
    params = init_params(kp, insize, sesize)

    fwd = jax.jit(tfsenet_forward)
    out = fwd(x, params)
    jax.block_until_ready(out)

    ref = reference_forward(x, params)
    np.testing.assert_allclose(np.asarray(out), np.asarray(ref), rtol=1e-5, atol=1e-6)
    assert out.shape == (B, 1, insize[0], insize[1])
    print("KERNEL_OK")
</pallas_src>

<mosaic_0001>
module attributes {stable_mosaic.version = 11 : i64} {
  func.func @_tfsenet_kernel(%arg0: i32, %arg1: memref<1x4x16x16xf32, #tpu.memory_space<vmem>>, %arg2: memref<16x8xf32, #tpu.memory_space<vmem>>, %arg3: memref<1x8xf32, #tpu.memory_space<vmem>>, %arg4: memref<8x16xf32, #tpu.memory_space<vmem>>, %arg5: memref<8x1xf32, #tpu.memory_space<vmem>>, %arg6: memref<8x16xf32, #tpu.memory_space<vmem>>, %arg7: memref<1x16xf32, #tpu.memory_space<vmem>>, %arg8: memref<16x8xf32, #tpu.memory_space<vmem>>, %arg9: memref<16x1xf32, #tpu.memory_space<vmem>>, %arg10: memref<1x1x16x16xf32, #tpu.memory_space<vmem>>) attributes {dimension_semantics = [#tpu.dimension_semantics<parallel>], iteration_bounds = array<i64: 2>, scalar_prefetch = 0 : i64, scratch_operands = 0 : i64, tpu.core_type = #tpu.core_type<tc>, window_params = [{transform_indices = @transform_0, window_bounds = array<i64: 1, 4, 16, 16>}, {pipeline_mode = #tpu.pipeline_mode<synchronous>, transform_indices = @transform_1, window_bounds = array<i64: 16, 8>}, {pipeline_mode = #tpu.pipeline_mode<synchronous>, transform_indices = @transform_2, window_bounds = array<i64: 1, 8>}, {pipeline_mode = #tpu.pipeline_mode<synchronous>, transform_indices = @transform_3, window_bounds = array<i64: 8, 16>}, {pipeline_mode = #tpu.pipeline_mode<synchronous>, transform_indices = @transform_4, window_bounds = array<i64: 8, 1>}, {pipeline_mode = #tpu.pipeline_mode<synchronous>, transform_indices = @transform_5, window_bounds = array<i64: 8, 16>}, {pipeline_mode = #tpu.pipeline_mode<synchronous>, transform_indices = @transform_6, window_bounds = array<i64: 1, 16>}, {pipeline_mode = #tpu.pipeline_mode<synchronous>, transform_indices = @transform_7, window_bounds = array<i64: 16, 8>}, {pipeline_mode = #tpu.pipeline_mode<synchronous>, transform_indices = @transform_8, window_bounds = array<i64: 16, 1>}, {transform_indices = @transform_9, window_bounds = array<i64: 1, 1, 16, 16>}]} {
    %c0 = arith.constant 0 : index
    %c0_0 = arith.constant 0 : index
    %c0_1 = arith.constant 0 : index
    %c0_2 = arith.constant 0 : index
    %0 = vector.load %arg1[%c0, %c0_0, %c0_1, %c0_2] : memref<1x4x16x16xf32, #tpu.memory_space<vmem>>, vector<1x4x16x16xf32>
    %1 = vector.shape_cast %0 : vector<1x4x16x16xf32> to vector<4x16x16xf32>
    %cst = arith.constant dense<0.000000e+00> : vector<16x16xf32>
    %2 = vector.multi_reduction <add>, %1, %cst [0] : vector<4x16x16xf32> to vector<16x16xf32>
    %cst_3 = arith.constant 4.000000e+00 : f32
    %3 = vector.broadcast %cst_3 : f32 to vector<16x16xf32>
    %4 = arith.divf %2, %3 : vector<16x16xf32>
    %c0_4 = arith.constant 0 : index
    %c0_5 = arith.constant 0 : index
    %5 = vector.load %arg2[%c0_4, %c0_5] : memref<16x8xf32, #tpu.memory_space<vmem>>, vector<16x8xf32>
    %cst_6 = arith.constant dense<0.000000e+00> : vector<16x8xf32>
    %6 = tpu.matmul %4, %5, %cst_6 {dimension_numbers = #tpu.dot_dimension_numbers<[1], [0], [0], [1], [0, 0, 1, 1], [], []>} : vector<16x16xf32>, vector<16x8xf32>, vector<16x8xf32> -> vector<16x8xf32>
    %c0_7 = arith.constant 0 : index
    %c0_8 = arith.constant 0 : index
    %7 = vector.load %arg3[%c0_7, %c0_8] : memref<1x8xf32, #tpu.memory_space<vmem>>, vector<1x8xf32>
    %8 = vector.broadcast %7 : vector<1x8xf32> to vector<16x8xf32>
    %9 = arith.addf %6, %8 : vector<16x8xf32>
    %cst_9 = arith.constant 0.000000e+00 : f32
    %10 = vector.broadcast %cst_9 : f32 to vector<16x8xf32>
    %11 = arith.maximumf %9, %10 : vector<16x8xf32>
    %c0_10 = arith.constant 0 : index
    %c0_11 = arith.constant 0 : index
    %12 = vector.load %arg4[%c0_10, %c0_11] : memref<8x16xf32, #tpu.memory_space<vmem>>, vector<8x16xf32>
    %cst_12 = arith.constant dense<0.000000e+00> : vector<8x8xf32>
    %13 = tpu.matmul %12, %11, %cst_12 {dimension_numbers = #tpu.dot_dimension_numbers<[1], [0], [0], [1], [0, 0, 1, 1], [], []>} : vector<8x16xf32>, vector<16x8xf32>, vector<8x8xf32> -> vector<8x8xf32>
    %c0_13 = arith.constant 0 : index
    %c0_14 = arith.constant 0 : index
    %14 = vector.load %arg5[%c0_13, %c0_14] : memref<8x1xf32, #tpu.memory_space<vmem>>, vector<8x1xf32>
    %15 = vector.broadcast %14 : vector<8x1xf32> to vector<8x8xf32>
    %16 = arith.addf %13, %15 : vector<8x8xf32>
    %cst_15 = arith.constant 0.000000e+00 : f32
    %17 = vector.broadcast %cst_15 : f32 to vector<8x8xf32>
    %18 = arith.maximumf %16, %17 : vector<8x8xf32>
    %c0_16 = arith.constant 0 : index
    %c0_17 = arith.constant 0 : index
    %19 = vector.load %arg6[%c0_16, %c0_17] : memref<8x16xf32, #tpu.memory_space<vmem>>, vector<8x16xf32>
    %cst_18 = arith.constant dense<0.000000e+00> : vector<8x16xf32>
    %20 = tpu.matmul %18, %19, %cst_18 {dimension_numbers = #tpu.dot_dimension_numbers<[1], [0], [0], [1], [0, 0, 1, 1], [], []>} : vector<8x8xf32>, vector<8x16xf32>, vector<8x16xf32> -> vector<8x16xf32>
    %c0_19 = arith.constant 0 : index
    %c0_20 = arith.constant 0 : index
    %21 = vector.load %arg7[%c0_19, %c0_20] : memref<1x16xf32, #tpu.memory_space<vmem>>, vector<1x16xf32>
    %22 = vector.broadcast %21 : vector<1x16xf32> to vector<8x16xf32>
    %23 = arith.addf %20, %22 : vector<8x16xf32>
    %24 = arith.negf %23 : vector<8x16xf32>
    %25 = math.exp %24 : vector<8x16xf32>
    %cst_21 = arith.constant 1.000000e+00 : f32
    %26 = vector.broadcast %cst_21 : f32 to vector<8x16xf32>
    %27 = arith.addf %26, %25 : vector<8x16xf32>
    %28 = arith.divf %26, %27 : vector<8x16xf32>
    %c0_22 = arith.constant 0 : index
    %c0_23 = arith.constant 0 : index
    %29 = vector.load %arg8[%c0_22, %c0_23] : memref<16x8xf32, #tpu.memory_space<vmem>>, vector<16x8xf32>
    %cst_24 = arith.constant dense<0.000000e+00> : vector<16x16xf32>
    %30 = tpu.matmul %29, %28, %cst_24 {dimension_numbers = #tpu.dot_dimension_numbers<[1], [0], [0], [1], [0, 0, 1, 1], [], []>} : vector<16x8xf32>, vector<8x16xf32>, vector<16x16xf32> -> vector<16x16xf32>
    %c0_25 = arith.constant 0 : index
    %c0_26 = arith.constant 0 : index
    %31 = vector.load %arg9[%c0_25, %c0_26] : memref<16x1xf32, #tpu.memory_space<vmem>>, vector<16x1xf32>
    %32 = vector.broadcast %31 : vector<16x1xf32> to vector<16x16xf32>
    %33 = arith.addf %30, %32 : vector<16x16xf32>
    %34 = arith.negf %33 : vector<16x16xf32>
    %35 = math.exp %34 : vector<16x16xf32>
    %cst_27 = arith.constant 1.000000e+00 : f32
    %36 = vector.broadcast %cst_27 : f32 to vector<16x16xf32>
    %37 = arith.addf %36, %35 : vector<16x16xf32>
    %38 = arith.divf %36, %37 : vector<16x16xf32>
    %c0_28 = arith.constant 0 : index
    %c0_29 = arith.constant 0 : index
    %c0_30 = arith.constant 0 : index
    %c0_31 = arith.constant 0 : index
    %39 = vector.load %arg10[%c0_28, %c0_29, %c0_30, %c0_31] : memref<1x1x16x16xf32, #tpu.memory_space<vmem>>, vector<1x1x16x16xf32>
    %40 = vector.shape_cast %39 : vector<1x1x16x16xf32> to vector<16x16xf32>
    %41 = vector.shape_cast %38 : vector<16x16xf32> to vector<1x1x16x16xf32>
    tpu.vector_store %arg10[%c0_28, %c0_29, %c0_30, %c0_31], %41 {strides = array<i32>} : memref<1x1x16x16xf32, #tpu.memory_space<vmem>>, vector<1x1x16x16xf32>,
    return
  }
  func.func @transform_0(%arg0: i32) -> (i32, i32, i32, i32) {
    %c0_i32 = arith.constant 0 : i32
    %c0_i32_0 = arith.constant 0 : i32
    %c0_i32_1 = arith.constant 0 : i32
    %c0_i32_2 = arith.constant 0 : i32
    return %arg0, %c0_i32, %c0_i32_0, %c0_i32_1 : i32, i32, i32, i32
  }
  func.func @transform_1(%arg0: i32) -> (i32, i32) {
    %c0_i32 = arith.constant 0 : i32
    %c0_i32_0 = arith.constant 0 : i32
    %c0_i32_1 = arith.constant 0 : i32
    return %c0_i32, %c0_i32_0 : i32, i32
  }
  func.func @transform_2(%arg0: i32) -> (i32, i32) {
    %c0_i32 = arith.constant 0 : i32
    %c0_i32_0 = arith.constant 0 : i32
    %c0_i32_1 = arith.constant 0 : i32
    return %c0_i32, %c0_i32_0 : i32, i32
  }
  func.func @transform_3(%arg0: i32) -> (i32, i32) {
    %c0_i32 = arith.constant 0 : i32
    %c0_i32_0 = arith.constant 0 : i32
    %c0_i32_1 = arith.constant 0 : i32
    return %c0_i32, %c0_i32_0 : i32, i32
  }
  func.func @transform_4(%arg0: i32) -> (i32, i32) {
    %c0_i32 = arith.constant 0 : i32
    %c0_i32_0 = arith.constant 0 : i32
    %c0_i32_1 = arith.constant 0 : i32
    return %c0_i32, %c0_i32_0 : i32, i32
  }
  func.func @transform_5(%arg0: i32) -> (i32, i32) {
    %c0_i32 = arith.constant 0 : i32
    %c0_i32_0 = arith.constant 0 : i32
    %c0_i32_1 = arith.constant 0 : i32
    return %c0_i32, %c0_i32_0 : i32, i32
  }
  func.func @transform_6(%arg0: i32) -> (i32, i32) {
    %c0_i32 = arith.constant 0 : i32
    %c0_i32_0 = arith.constant 0 : i32
    %c0_i32_1 = arith.constant 0 : i32
    return %c0_i32, %c0_i32_0 : i32, i32
  }
  func.func @transform_7(%arg0: i32) -> (i32, i32) {
    %c0_i32 = arith.constant 0 : i32
    %c0_i32_0 = arith.constant 0 : i32
    %c0_i32_1 = arith.constant 0 : i32
    return %c0_i32, %c0_i32_0 : i32, i32
  }
  func.func @transform_8(%arg0: i32) -> (i32, i32) {
    %c0_i32 = arith.constant 0 : i32
    %c0_i32_0 = arith.constant 0 : i32
    %c0_i32_1 = arith.constant 0 : i32
    return %c0_i32, %c0_i32_0 : i32, i32
  }
  func.func @transform_9(%arg0: i32) -> (i32, i32, i32, i32) {
    %c0_i32 = arith.constant 0 : i32
    %c0_i32_0 = arith.constant 0 : i32
    %c0_i32_1 = arith.constant 0 : i32
    %c0_i32_2 = arith.constant 0 : i32
    return %arg0, %c0_i32, %c0_i32_0, %c0_i32_1 : i32, i32, i32, i32
  }
}

</mosaic_0001>

<bundles_post_ra>
// kernel: tfsenet_forward.1
= control target key start
LH: loop header
LB: loop body
LE: loop exit
PB: predicated region body
PF: predicated region fallthrough
CT: control target
= control target key end

     0   :  { %14 = vsyncpa [#allocation3], 0  ;;  %s1109_s0 = inlined_call_operand.hbm [shape: f32[2,4,16,16], index: 0, kind: input, shape index: {}]   ;;  %s1110_s1 = inlined_call_operand.vmem [shape: f32[16,8], index: 1, kind: input, shape index: {}]   ;;  %s1111_s2 = inlined_call_operand.vmem [shape: f32[1,8], index: 2, kind: input, shape index: {}]   ;;  %s1112_s3 = inlined_call_operand.vmem [shape: f32[8,16], index: 3, kind: input, shape index: {}]   ;;  %s1113_s4 = inlined_call_operand.vmem [shape: f32[8,1], index: 4, kind: input, shape index: {}]   ;;  %s1114_s5 = inlined_call_operand.vmem [shape: f32[8,16], index: 5, kind: input, shape index: {}]   ;;  %s1115_s6 = inlined_call_operand.vmem [shape: f32[1,16], index: 6, kind: input, shape index: {}]   ;;  %s1116_s7 = inlined_call_operand.vmem [shape: f32[16,8], index: 7, kind: input, shape index: {}]   ;;  %s1117_s8 = inlined_call_operand.vmem [shape: f32[16,1], index: 8, kind: input, shape index: {}]   ;;  %s1118_s9 = inlined_call_operand.hbm [shape: f32[2,1,16,16], index: 9, kind: output, shape index: {}]  }
   0x1   :  { %16 = vsyncpa [#allocation3 + $0x1], 0 }
   0x2   :  { %17 = vsyncpa [#allocation4], 0 }
   0x3   :  { %19 = vsyncpa [#allocation4 + $0x1], 0  ;;  %s922_s30 = smov 0   ;;  %s924_s10 = smov 0  }
   0x4   :  { %s926_s11 = smov 0   ;;  %s928_s12 = smov 0  }
   0x5 LB: > { %1122 = sst [smem:[#allocation8_spill]] %s860_s11  ;;  %s943_s13 = sadd.s32 4294967295, %s864_s12   ;;  %s864_s12 = sphi %s928_s12, %s1131_s12   ;;  %s860_s11 = sphi %s926_s11, %s1133_s11   ;;  %s856_s10 = sphi %s924_s10, %s1135_s10   ;;  %s852_s30 = sphi %s922_s30, %s1134_s30  }
   0x6   : > { %s673_s14 = sadd.s32 4294967294, %s864_s12   ;;  %s947_s15 = sadd.s32 1, %s864_s12  }
   0x7   : > { %1123 = sst [smem:[#allocation9_spill]] %s947_s15  ;;  %s32_s16 = sadd.s32 1, %s860_s11 }
   0x8   : > { %s29_s17 = ssub.s32 %s864_s12, %s947_s15  ;;  %p39_p0 = scmp.ne.s32.totalorder %s860_s11, %s856_s10 }
   0x9   : > { %p30_p1 = scmp.eq.s32.totalorder %s29_s17, 0  ;;  %p40_p2 = scmp.eq.s32.totalorder %s864_s12, 0 }
   0xa   : > { %p45_p3 = scmp.ne.s32.totalorder %s856_s10, %s852_s30  ;;  %p46_p4 = scmp.eq.s32.totalorder %s943_s13, 0 }
   0xb   : > { %s959_s18 = scalar_select %p30_p1, %s860_s11, %s32_s16  }
   0xc   : > { %p961_p5 = por %p40_p2, %p39_p0  ;;  %p965_p6 = por %p46_p4, %p45_p3 }
   0xd   : > { %1124 = sst [smem:[#allocation10_spill]] %s959_s18  ;;  %p237_p7 = scmp.eq.s32.totalorder %s943_s13, 1 }
   0xe   : > { %p243_p8 = scmp.eq.s32.totalorder %s673_s14, 1  ;;  %p710_p10 = scmp.lt.s32.totalorder %s864_s12, 2 }
   0xf   : > { %p972_p11 = por %p237_p7, %p39_p0  ;;  %s287_s23 = sand.u32 1, %s860_s11  }
  0x10   : > { %p976_p12 = por %p243_p8, %p45_p3  ;;  %s696_s24 = sshll.u32 %s864_s12, 6 }
  0x11   : > { %s676_s25 = sshll.u32 %s287_s23, 6  ;;  %s296_s28 = scalar_lea.hbm %s1109_s0, %s696_s24 }
  0x12   : > { %s297_s29 = sshll.u32 %s296_s28, 4  ;;  %s291_s14 = scalar_lea.vmem [#allocation2], %s676_s25  ;;  %s298_s29 = int_to_ptr.hbm [resolvable:$true] %s297_s29 }
  0x13   : > { %s299_s16 = sshll.u32 %s291_s14, 4  ;;  %p987_p13 = pnand %p710_p10, %p961_p5  ;;  %s300_s16 = int_to_ptr.vmem [resolvable:$true] %s299_s16 }
  0x14   : > { %p679_p0 = scmp.ge.s32.totalorder %s864_s12, 1  ;;  %p307_p1 = scmp.lt.s32.totalorder %s864_s12, 3 }
  0x15   : > { %s288_s18 = scalar_lea.sflag [#allocation3], %s287_s23  ;;  %s768_s11 = sshra.s32 %s298_s29, 4  ;;  %s769_s11 = int_to_ptr.hbm [resolvable:$true] %s768_s11 }
  0x16   : > { %s770_s15 = scalar_lea.hbm %s769_s11, 64  ;;  %p772_p3 = pneg %p987_p13 }
  0x17   : > { %p771_p2 = scmp.ne.s32.totalorder %s769_s11, %s770_s15  ;;  %s775_s19 = scalar_lea.hbm %s1109_s0, 128 }
  0x18   : > { %p776_p5 = scmp.lt.s32.totalorder %s769_s11, %s1109_s0  ;;  %p777_p8 = scmp.lt.s32.totalorder %s775_s19, %s770_s15 }
  0x19   : > { %p773_p4 = pnand %p772_p3, %p771_p2 }
  0x1a   : > { %p778_p10 = por %p777_p8, %p776_p5 }
  0x1b   : > { %p774_p7 = pneg %p773_p4 }
  0x1d   : > { %p779_p9 = pnand %p778_p10, %p774_p7 }
  0x1f   : > { %782 = shalt.err (!%p779_p9)
}
  0x20   : > { %s866_s23 = smov 128   ;;  %s867_s28 = smov 8  }
  0x21   : > { %705 = dma.hbm_to_vmem [thread:$0]  (!%p987_p13), %s298_s29, 1024, %s300_s16, %s288_s18, %s866_s23, %s866_s23, %s867_s28  }
  0x22   : > { %p308_p2 = pnand %p679_p0, %p307_p1 }
  0x23   : > { %s1008_s14 = sand.u32 (!%p308_p2), 1, %s856_s10  }
  0x24   : > { %311 = sbr.rel (%p308_p2) target bundleno = 669 (0x29d), region = 56  ;;  %s680_s11 = sshll.u32 (!%p308_p2), %s1008_s14, 6 }
  0x25   : > { %s314_s15 = scalar_lea.sflag (!%p308_p2), [#allocation3], %s1008_s14  ;;  %s1012_s24 = scalar_lea.vmem (!%p308_p2), [#allocation2], %s680_s11 }
  0x29   : > { %843 = dma.done.wait (%p965_p6), %s314_s15, 1024  }
  0x2a   : > { %845 = vsyncadd (%p965_p6), %s314_s15, 4294966272  ;;  %v868_v0 = vmov 4.0   ;;  %vm361_vm0 = vcmask 130048   ;;  %v386_v2 = vld [vmem:[%s1110_s1 + $0x8] sm:$0xff]  ;;  %v385_v3 = vld [vmem:[%s1110_s1] sm:$0xff]  ;;  %v869_v34 = vmov 0  }
  0x2b   : > { %754 = vrcp.f32 %v868_v0  ;;  %v353_v4 = vld [vmem:[%s1012_s24] sm:$0xff]  ;;  %411 = vmatpush.msra.mxu0 %v386_v2  ;;  %v355_v5 = vld [vmem:[%s1012_s24 + $0x10] sm:$0xff]  ;;  %v354_v12 = vld [vmem:[%s1012_s24 + $0x8] sm:$0xff]  ;;  %750 = vset.pattern.permute.xlu0 %v869_v34  ;;  %vm458_vm2 = vcmask 64512   ;;  %s681_s27 = sshll.u32 %s1008_s14, 4  ;;  %s697_s23 = sshll.u32 %s943_s13, 4 }
  0x2c   : > { %v357_v6 = vld [vmem:[%s1012_s24 + $0x20] sm:$0xff]  ;;  %v359_v7 = vld [vmem:[%s1012_s24 + $0x30] sm:$0xff]  ;;  %v362_v8 = vsel %vm361_vm0, %v353_v4, 0.0  ;;  %v363_v10 = vsel %vm361_vm0, %v355_v5, 0.0  ;;  %v356_v13 = vld [vmem:[%s1012_s24 + $0x18] sm:$0xff]  ;;  %v369_v17 = vsel %vm361_vm0, %v354_v12, 0.0  ;;  %751 = vset.pattern.permute.xlu1 %v869_v34  ;;  %s596_s15 = scalar_lea.hbm %s1118_s9, %s697_s23 }
  0x2d   : > { %v365_v11 = vsel %vm361_vm0, %v357_v6, 0.0  ;;  %v358_v14 = vld [vmem:[%s1012_s24 + $0x28] sm:$0xff]  ;;  %412 = vmatpush.msra.mxu0 %v385_v3  ;;  %v364_v15 = vadd.f32 %v363_v10, %v362_v8  ;;  %v370_v18 = vsel %vm361_vm0, %v356_v13, 0.0  ;;  %v367_v19 = vsel %vm361_vm0, %v359_v7, 0.0  ;;  %v360_v24 = vld [vmem:[%s1012_s24 + $0x38] sm:$0xff]  ;;  %v423_v33 = vld [vmem:[%s1113_s4] sm:$0xff] }
  0x2e   : > { %v371_v20 = vadd.f32 %v370_v18, %v369_v17  ;;  %v372_v23 = vsel %vm361_vm0, %v358_v14, 0.0  ;;  %v374_v29 = vsel %vm361_vm0, %v360_v24, 0.0  ;;  %426 = vperm.xlu0 %750, %v423_v33   ;;  %v503_v35 = vld [vmem:[%s1117_s8] sm:$0xff]  ;;  %v504_v53 = vld [vmem:[%s1117_s8 + $0x8] sm:$0xff]  ;;  %s352_s24 = scalar_lea.vmem [#allocation5], %s681_s27  ;;  %s599_s18 = sshll.u32 %s596_s15, 4  ;;  %s600_s18 = int_to_ptr.hbm [resolvable:$true] %s599_s18 }
  0x2f   : > { %v366_v21 = vadd.f32 %v365_v11, %v364_v15  ;;  %v752_v37 = vld [vmem:[%s1111_s2] ss:$0 sm:$0xff]  ;;  %512 = vperm.xlu1 %751, %v504_v53   ;;  %v502_v3 = vld [vmem:[%s1116_s7 + $0x8] sm:$0xff]  ;;  %s597_s13 = sshll.u32 %s352_s24, 4  ;;  %s585_s29 = scalar_lea.sflag [#allocation4], %s1008_s14  ;;  %s598_s13 = int_to_ptr.vmem [resolvable:$true] %s597_s13 }
  0x30   : > { %v373_v27 = vadd.f32 %v372_v23, %v371_v20  ;;  %v422_v43 = vld [vmem:[%s1112_s3] sm:$0xff]  ;;  %s812_s16 = sshra.s32 %s600_s18, 4  ;;  %s818_s19 = scalar_lea.hbm %s1118_s9, 32  ;;  %s813_s16 = int_to_ptr.hbm [resolvable:$true] %s812_s16 }
  0x31   : > { %v755_v1 = vpop.eup %754  ;;  %v368_v25 = vadd.f32 %v367_v19, %v366_v21  ;;  %v453_v44 = vld [vmem:[%s1114_s5] sm:$0xff]  ;;  %s814_s17 = scalar_lea.hbm %s813_s16, 16  ;;  %p819_p0 = scmp.lt.s32.totalorder %s813_s16, %s1118_s9 }
  0x32   : > { %v377_v9 = vmul.f32 4.0, %v755_v1  ;;  %vm381_vm1 = vweird.f32 %v755_v1  ;;  %v375_v31 = vadd.f32 %v374_v29, %v373_v27  ;;  %477 = vmatpush.msra.mxu2 %v453_v44  ;;  %v753_v49 = vld [vmem:[%s1115_s6] ss:$0 sm:$0xff]  ;;  %p815_p6 = scmp.ne.s32.totalorder %s813_s16, %s814_s17  ;;  %p820_p1 = scmp.lt.s32.totalorder %s818_s19, %s814_s17 }
  0x34   : > { %v378_v16 = vsub.f32 1.0, %v377_v9  ;;  %p816_p9 = pnand %p815_p6, %p972_p11  ;;  %p821_p3 = por %p820_p1, %p819_p0 }
  0x36   : > { %v379_v22 = vmul.f32 %v755_v1, %v378_v16  ;;  %507 = vperm.xlu0 %750, %v503_v35   ;;  %p817_p13 = pneg %p816_p9 }
  0x38   : > { %v380_v26 = vadd.f32 %v755_v1, %v379_v22  ;;  %p822_p4 = pnand %p821_p3, %p817_p13 }
  0x3a   : > { %v382_v28 = vsel %vm381_vm1, %v755_v1, %v380_v26  ;;  %v501_v1 = vld [vmem:[%s1116_s7] sm:$0xff] }
  0x3b   : > { %v383_v30 = vmul.f32 %v382_v28, %v368_v25  ;;  %v384_v32 = vmul.f32 %v382_v28, %v375_v31 }
  0x3d   : > { %682 = vmatmul.msk.f32.vlgmr.msra.gmra.mxu0 %vm361_vm0, %v383_v30 }
  0x45   : > { %683 = vmatmul.msk.f32.gmra.mxu0 %vm361_vm0, %v384_v32 }
  0xa0   : > { %v427_v45 = vpop.permute.xlu0 %426 }
  0xa1   : > { %v513_v8 = vpop.permute.xlu1 %512 }
  0xa8   : > { %v508_v4 = vpop.permute.xlu0 %507 }
  0xba   : > { %v414_v36 = vpop.f32.mrf.mxu0 }
  0xbb   : > { %v415_v39 = vadd.f32 %v752_v37, %v414_v36 }
  0xbd   : > { %v420_v42 = vmax.f32 %v415_v39, 0.0 }
  0xc2   : > { %v417_v38 = vpop.f32.mrf.mxu0 }
  0xc3   : > { %v418_v40 = vadd.f32 %v752_v37, %v417_v38 }
  0xc5   : > { %v421_v41 = vmax.f32 %v418_v40, 0.0 }
  0xc7   : > { %446 = vmatpush.msra.mxu1 %v421_v41 }
  0xc9   : > { %447 = vmatpush.msra.mxu1 %v420_v42 }
  0xca   : > { %684 = vmatmul.msk.f32.vlgmr.msra.gmra.mxu1 %vm361_vm0, %v422_v43 }
 0x147   : > { %v449_v46 = vpop.f32.mrf.mxu1 }
 0x148   : > { %v450_v47 = vadd.f32 %v449_v46, %v427_v45 }
 0x14a   : > { %v452_v48 = vmax.f32 %v450_v47, 0.0 }
 0x14c   : > { %685 = vmatmul.msk.f32.vlgmr.msra.gmra.mxu2 %vm458_vm2, %v452_v48 }
 0x1cf   : > { %v479_v50 = vpop.f32.mrf.mxu2 }
 0x1d0   : > { %v480_v51 = vadd.f32 %v753_v49, %v479_v50 }
 0x1d2   : > { %v686_v52 = vmul.f32 -1.442695, %v480_v51 }
 0x1d4   : > { %756 = vpow2.f32 %v686_v52 }
 0x1da   : > { %v757_v54 = vpop.eup %756 }
 0x1db   : > { %v485_v55 = vadd.f32 1.0, %v757_v54 }
 0x1dd   : > { %758 = vrcp.f32 %v485_v55  ;;  %v497_v59 = vand.u32 2147483648, %v485_v55  ;;  %v495_v61 = vand.u32 2147483647, %v485_v55  ;;  %vm491_vm4 = vweird.f32 %v485_v55 }
 0x1df   : > { %v498_v63 = vor.u32 1.1754944e-38, %v497_v59  ;;  %vm496_vm6 = vcmp.eq.f32.partialorder %v495_v61, 8.507059e+37 }
 0x1e3   : > { %v759_v56 = vpop.eup %758 }
 0x1e4   : > { %v487_v57 = vmul.f32 %v759_v56, %v485_v55  ;;  %vm492_vm3 = vweird.f32 %v759_v56 }
 0x1e5   : > { %vm493_vm5 = vmor %vm491_vm4, %vm492_vm3 }
 0x1e6   : > { %v488_v58 = vsub.f32 1.0, %v487_v57 }
 0x1e8   : > { %v489_v60 = vmul.f32 %v759_v56, %v488_v58 }
 0x1ea   : > { %v490_v62 = vadd.f32 %v759_v56, %v489_v60 }
 0x1ec   : > { %v494_v0 = vsel %vm493_vm5, %v759_v56, %v490_v62 }
 0x1ed   : > { %v499_v2 = vsel %vm496_vm6, %v498_v63, %v494_v0 }
 0x1ee   : > { %536 = vmatpush.msra.mxu3 %v499_v2 }
 0x1ef   : > { %687 = vmatmul.msk.f32.vlgmr.msra.gmra.mxu3 %vm458_vm2, %v501_v1 }
 0x1f7   : > { %688 = vmatmul.msk.f32.gmra.mxu3 %vm458_vm2, %v502_v3 }
 0x272   : > { %v538_v5 = vpop.f32.mrf.mxu3 }
 0x273   : > { %v539_v6 = vadd.f32 %v538_v5, %v508_v4 }
 0x275   : > { %v689_v7 = vmul.f32 -1.442695, %v539_v6 }
 0x277   : > { %760 = vpow2.f32 %v689_v7 }
 0x27a   : > { %v541_v9 = vpop.f32.mrf.mxu3 }
 0x27b   : > { %v542_v10 = vadd.f32 %v541_v9, %v513_v8 }
 0x27d   : > { %v761_v11 = vpop.eup %760  ;;  %v690_v12 = vmul.f32 -1.442695, %v542_v10 }
 0x27e   : > { %v550_v13 = vadd.f32 1.0, %v761_v11 }
 0x27f   : > { %762 = vpow2.f32 %v690_v12 }
 0x280   : > { %764 = vrcp.f32 %v550_v13  ;;  %v563_v19 = vand.u32 2147483648, %v550_v13  ;;  %v561_v21 = vand.u32 2147483647, %v550_v13  ;;  %vm557_vm8 = vweird.f32 %v550_v13 }
 0x282   : > { %v564_v24 = vor.u32 1.1754944e-38, %v563_v19  ;;  %vm562_vm10 = vcmp.eq.f32.partialorder %v561_v21, 8.507059e+37 }
 0x285   : > { %v763_v14 = vpop.eup %762 }
 0x286   : > { %v765_v15 = vpop.eup %764  ;;  %v551_v16 = vadd.f32 1.0, %v763_v14 }
 0x287   : > { %v553_v17 = vmul.f32 %v765_v15, %v550_v13  ;;  %vm558_vm7 = vweird.f32 %v765_v15 }
 0x288   : > { %766 = vrcp.f32 %v551_v16  ;;  %vm559_vm9 = vmor %vm557_vm8, %vm558_vm7  ;;  %v578_v29 = vand.u32 2147483648, %v551_v16  ;;  %v576_v31 = vand.u32 2147483647, %v551_v16  ;;  %vm572_vm12 = vweird.f32 %v551_v16 }
 0x289   : > { %v554_v18 = vsub.f32 1.0, %v553_v17 }
 0x28a   : > { %v579_v33 = vor.u32 1.1754944e-38, %v578_v29  ;;  %vm577_vm14 = vcmp.eq.f32.partialorder %v576_v31, 8.507059e+37 }
 0x28b   : > { %v555_v20 = vmul.f32 %v765_v15, %v554_v18 }
 0x28d   : > { %v556_v22 = vadd.f32 %v765_v15, %v555_v20 }
 0x28e   : > { %v767_v23 = vpop.eup %766 }
 0x28f   : > { %v560_v25 = vsel %vm559_vm9, %v765_v15, %v556_v22  ;;  %v568_v26 = vmul.f32 %v767_v23, %v551_v16  ;;  %vm573_vm11 = vweird.f32 %v767_v23 }
 0x290   : > { %v565_v27 = vsel %vm562_vm10, %v564_v24, %v560_v25  ;;  %vm574_vm13 = vmor %vm572_vm12, %vm573_vm11 }
 0x291   : > { %v569_v28 = vsub.f32 1.0, %v568_v26  ;;  %582 = vst.msk [vmem:[%s352_s24] sm:$0xff] %vm361_vm0, %v565_v27 }
 0x293   : > { %v570_v30 = vmul.f32 %v767_v23, %v569_v28 }
 0x295   : > { %v571_v32 = vadd.f32 %v767_v23, %v570_v30 }
 0x297   : > { %v575_v34 = vsel %vm574_vm13, %v767_v23, %v571_v32 }
 0x298   : > { %v580_v35 = vsel %vm577_vm14, %v579_v33, %v575_v34 }
 0x299   : > { %583 = vst.msk [vmem:[%s352_s24 + $0x8] sm:$0xff] %vm361_vm0, %v580_v35 }
 0x29a   : > { %825 = shalt.err (!%p822_p4)
}
 0x29b   : > { %s870_s14 = smov 128   ;;  %s871_s23 = smov 8  }
 0x29c   : > { %700 = dma.vmem_to_hbm [thread:$0]  (%p972_p11), %s598_s13, 256, %s600_s18, %s585_s29, %s870_s14, %s870_s14, %s871_s23  }
 0x29d PF: > { %s614_s28 = sand.u32 1, %s852_s30   ;;  %p1130_p7 = scmp.ge.s32.totalorder %s864_s12, 2 }
 0x29e   : > { %s615_s11 = scalar_lea.sflag [#allocation4], %s614_s28 }
 0x29f   : > { %p707_p5 = pnand %p1130_p7, %p976_p12 }
 0x2a1   : > { %p708_p8 = pneg %p707_p5 }
 0x2a3   : > { %847 = dma.done.wait (%p708_p8), %s615_s11, 256  }
 0x2a4   : > { %849 = vsyncadd (%p708_p8), %s615_s11, 4294967040  ;;  %s1131_s12 = sld [smem:[#allocation9_spill]]  ;;  %s1134_s30 = smov %s856_s10 }
 0x2a5   : > { %s1132_s15 = sld [smem:[#allocation8_spill]] }
 0x2a6   : > { %s1133_s11 = sld [smem:[#allocation10_spill]] }
 0x2aa   : > { %p22_p10 = scmp.ge.s32.totalorder %s1131_s12, 4  }
 0x2ab   : > { %s1135_s10 = smov %s1132_s15 }
 0x2ac   :  { %24 = sbr.rel (!%p22_p10) target bundleno = 5 (0x5), region = 101 }
 0x2b1   :  { %621 = vsyncpa [#allocation3], 1 }
 0x2b2   :  { %623 = vsyncpa [#allocation3 + $0x1], 1 }
 0x2b3   :  { %624 = vsyncpa [#allocation4], 1 }
 0x2b4   :  { %626 = vsyncpa [#allocation4 + $0x1], 1 }

</bundles_post_ra>
